<compile_context>
chip_gen: v7x
topology: tpu7x:2x2x1
jax: 0.10.0
libtpu: 0.0.40
codegen_flags: <defaults>
</compile_context>

<pallas_src>
import functools

import jax
import jax.numpy as jnp
from jax.experimental import pallas as pl
from jax.experimental.pallas import tpu as pltpu

LANE = 128
_VMEM = pl.BlockSpec(memory_space=pltpu.MemorySpace.VMEM)


def _round_up(n, m):
    return ((n + m - 1) // m) * m


# ---------------------------------------------------------------------------
# Fused wavefront kernel: all RNN layers + fc in one call
# ---------------------------------------------------------------------------
def make_wavefront_rnn_kernel(num_layers, seq, hidden):
    """Kernel for fixed (static) num_layers / seq / hidden.

    Inputs (all VMEM, prepared once in prepare_fused_params):
      x        (T, in)        : the single sequence (batch == 1)
      w_in     (in, L*H)      : W_ih^0.T lane-padded into block 0, zeros elsewhere
      w_blk    (L*H, L*H)     : block matrix [W_hh^l.T on diag, W_ih^{l+1}.T super-diag]
      add_base (T+L-1, L*H)   : per-wavefront-step biases, zero where (layer, step)
                                is outside the wavefront
      fc_w     (L*H, out_pad) : fc weight embedded at the last layer's block rows
      fc_b     (1, out_pad)   : fc bias, lane-padded
    Outputs:
      out      (T, out_pad)
      h_last   (L, H)
    Scratch:
      add_scr  (T+L-1, L*H)   : combined per-step additive rows
      rows_scr (T, L*H)       : wavefront state after step s = t + L - 1
                                (block L-1 of row t == h_{L-1}^t)
    """
    T, L, H = seq, num_layers, hidden
    TW = T + L - 1
    LH = L * H

    def kernel(x_ref, w_in_ref, w_blk_ref, add_base_ref, fc_w_ref, fc_b_ref,
               out_ref, h_last_ref, add_scr, rows_scr):
        # ---- Hoisted layer-0 input projection: one wide MXU matmul. ----------
        # w_in is zero outside block 0, so the result already sits at the fused
        # state width with zeros in every other layer's lanes.
        u_wide = jnp.dot(x_ref[...], w_in_ref[...],
                         preferred_element_type=jnp.float32)          # (T, L*H)

        # Combined per-step additive term, written to VMEM so per-step reads are
        # plain vector loads (no sublane extraction on the serial chain).
        add_scr[0:T, :] = add_base_ref[0:T, :] + u_wide
        if TW > T:
            add_scr[T:TW, :] = add_base_ref[T:TW, :]

        # Pre-issue every per-step row load; independent of the recurrence, so
        # the scheduler hoists them off the MXU->tanh critical path.
        add_rows = [add_scr[s:s + 1, :] for s in range(TW)]
        w_blk = w_blk_ref[...]                                         # (L*H, L*H)

        # ---- Wavefront recurrence: T + L - 1 serial MXU -> tanh steps. -------
        # At the start of step s, block l of h_blk holds h_l^{(s-1)-l} (zero for
        # negative times).  One fused (1, L*H) @ (L*H, L*H) matmul advances every
        # layer's diagonal element simultaneously.
        h_blk = jnp.zeros((1, LH), jnp.float32)
        for s in range(TW):
            h_blk = jnp.tanh(
                jnp.dot(h_blk, w_blk, preferred_element_type=jnp.float32)
                + add_rows[s])
            if s >= L - 1:                       # last layer active from step L-1
                rows_scr[s - (L - 1):s - L + 2, :] = h_blk   # off-path row store

        # ---- fc epilogue on the resident slab. --------------------------------
        # fc_w is zero except at the last layer's block rows, so no lane
        # extraction is needed; the (T, out_pad) store is lane-dense.
        out_ref[...] = (jnp.dot(rows_scr[...], fc_w_ref[...],
                                preferred_element_type=jnp.float32)
                        + fc_b_ref[...])

        # ---- Final hidden state of every layer: one deferred store. -----------
        # Layer l finishes at wavefront step T-1+l, i.e. rows_scr row T-L+l.
        h_last_ref[...] = jnp.concatenate(
            [rows_scr[T - L + l:T - L + l + 1, l * H:(l + 1) * H]
             for l in range(L)],
            axis=0)

    return kernel


# ---------------------------------------------------------------------------
# One-time parameter preparation (block matrix, padding, bias pattern)
# ---------------------------------------------------------------------------
def prepare_fused_params(raw, seq_len):
    """Build all kernel operands once, off the per-call path."""
    L = len(raw["layers"])
    H = raw["layers"][0]["w_hh"].shape[0]
    in_size = raw["layers"][0]["w_ih"].shape[1]
    out_size = raw["fc_w"].shape[0]
    T = seq_len
    assert T >= L, "wavefront layout assumes seq_len >= num_layers"
    TW = T + L - 1
    LH = L * H

    # Layer-0 input projection weight, lane-padded into block 0.
    w_in = jnp.zeros((in_size, LH), jnp.float32)
    w_in = w_in.at[:, 0:H].set(raw["layers"][0]["w_ih"].T)

    # Block recurrent matrix: diag W_hh^l.T, super-diag W_ih^{l+1}.T.
    w_blk = jnp.zeros((LH, LH), jnp.float32)
    for l in range(L):
        w_blk = w_blk.at[l * H:(l + 1) * H, l * H:(l + 1) * H].set(
            raw["layers"][l]["w_hh"].T)
        if l + 1 < L:
            w_blk = w_blk.at[l * H:(l + 1) * H, (l + 1) * H:(l + 2) * H].set(
                raw["layers"][l + 1]["w_ih"].T)

    # Per-wavefront-step bias pattern: layer l active on steps l .. T-1+l.
    add_base = jnp.zeros((TW, LH), jnp.float32)
    for l in range(L):
        b = raw["layers"][l]["b_ih"] + raw["layers"][l]["b_hh"]
        add_base = add_base.at[l:T + l, l * H:(l + 1) * H].set(
            jnp.broadcast_to(b, (T, H)))

    # fc weight embedded at the LAST layer's block rows; output lane-padded.
    out_pad = _round_up(out_size, LANE)
    fc_w = jnp.zeros((LH, out_pad), jnp.float32)
    fc_w = fc_w.at[(L - 1) * H:L * H, 0:out_size].set(raw["fc_w"].T)
    fc_b = jnp.zeros((1, out_pad), jnp.float32)
    fc_b = fc_b.at[0, 0:out_size].set(raw["fc_b"])

    fused = {"w_in": w_in, "w_blk": w_blk, "add_base": add_base,
             "fc_w": fc_w, "fc_b": fc_b}
    dims = (L, H, in_size, out_size, T, out_pad)
    return fused, dims


# ---------------------------------------------------------------------------
# Per-call wrapper (jit): only the pallas_call + a slice / reshape
# ---------------------------------------------------------------------------
@functools.partial(jax.jit, static_argnames=("dims",))
def rnn_model_forward(x, fused, *, dims):
    """x: (1, seq, input_size) -> (output (seq, out_size), hidden (L, 1, H))."""
    L, H, in_size, out_size, T, out_pad = dims
    x2 = x[0].astype(jnp.float32)                  # batch == 1 (init_hidden)
    TW = T + L - 1
    LH = L * H

    kernel = make_wavefront_rnn_kernel(L, T, H)
    out_padded, h_last = pl.pallas_call(
        kernel,
        out_shape=(jax.ShapeDtypeStruct((T, out_pad), jnp.float32),
                   jax.ShapeDtypeStruct((L, H), jnp.float32)),
        in_specs=[_VMEM] * 6,
        out_specs=(_VMEM, _VMEM),
        scratch_shapes=[pltpu.VMEM((TW, LH), jnp.float32),   # add rows
                        pltpu.VMEM((T, LH), jnp.float32)],   # wavefront rows
        compiler_params=pltpu.CompilerParams(
            vmem_limit_bytes=4 * 1024 * 1024),
    )(x2, fused["w_in"], fused["w_blk"], fused["add_base"],
      fused["fc_w"], fused["fc_b"])

    out = out_padded[:, :out_size]                 # (seq, out_size)
    hidden_state = h_last[:, None, :]              # (L, 1, H)
    return out, hidden_state


# ---------------------------------------------------------------------------
# Pure-JAX reference (mirrors the PyTorch math directly, for correctness)
# ---------------------------------------------------------------------------
def rnn_model_ref(x, raw):
    h_seq = x[0].astype(jnp.float32)
    h_lasts = []
    for layer in raw["layers"]:
        w_ih, w_hh = layer["w_ih"], layer["w_hh"]
        b_ih, b_hh = layer["b_ih"], layer["b_hh"]
        h = jnp.zeros((w_hh.shape[0],), jnp.float32)
        outs = []
        for t in range(h_seq.shape[0]):
            h = jnp.tanh(h_seq[t] @ w_ih.T + b_ih + h @ w_hh.T + b_hh)
            outs.append(h)
        h_seq = jnp.stack(outs, axis=0)
        h_lasts.append(h)
    hidden_state = jnp.stack(h_lasts, axis=0)[:, None, :]
    out = h_seq @ raw["fc_w"].T + raw["fc_b"]
    return out, hidden_state


# ---------------------------------------------------------------------------
# Deterministic parameter init (PyTorch shapes; uniform(-1/sqrt(H), 1/sqrt(H)))
# ---------------------------------------------------------------------------
def init_params(key, input_size, output_size, hidden_size, num_layers):
    k = hidden_size ** -0.5
    layers = []
    for l in range(num_layers):
        in_dim = input_size if l == 0 else hidden_size
        key, k1, k2, k3, k4 = jax.random.split(key, 5)
        layers.append({
            "w_ih": jax.random.uniform(k1, (hidden_size, in_dim), jnp.float32, -k, k),
            "w_hh": jax.random.uniform(k2, (hidden_size, hidden_size), jnp.float32, -k, k),
            "b_ih": jax.random.uniform(k3, (hidden_size,), jnp.float32, -k, k),
            "b_hh": jax.random.uniform(k4, (hidden_size,), jnp.float32, -k, k),
        })
    key, k5, k6 = jax.random.split(key, 3)
    fc_w = jax.random.uniform(k5, (output_size, hidden_size), jnp.float32, -k, k)
    fc_b = jax.random.uniform(k6, (output_size,), jnp.float32, -k, k)
    return {"layers": layers, "fc_w": fc_w, "fc_b": fc_b}


# ---------------------------------------------------------------------------
if __name__ == "__main__":
    input_size, output_size, hidden_size, num_layers = 16, 10, 32, 2
    seq_len, batch = 8, 1   # init_hidden() hard-codes batch == 1

    key = jax.random.PRNGKey(0)
    key, pkey, xkey = jax.random.split(key, 3)
    raw = init_params(pkey, input_size, output_size, hidden_size, num_layers)
    fused, dims = prepare_fused_params(raw, seq_len)
    x = jax.random.normal(xkey, (batch, seq_len, input_size), jnp.float32)

    out, hidden_state = rnn_model_forward(x, fused, dims=dims)
    out = jax.block_until_ready(out)
    hidden_state = jax.block_until_ready(hidden_state)

    out_ref, hidden_ref = rnn_model_ref(x, raw)
    assert out.shape == (seq_len * batch, output_size)
    assert hidden_state.shape == (num_layers, 1, hidden_size)
    # f32 matmuls hit the MXU via multi-pass bf16; 1e-4 is comfortable for the
    # tanh-bounded values here.
    assert jnp.allclose(out, out_ref, atol=1e-4, rtol=1e-4), \
        float(jnp.max(jnp.abs(out - out_ref)))
    assert jnp.allclose(hidden_state, hidden_ref, atol=1e-4, rtol=1e-4), \
        float(jnp.max(jnp.abs(hidden_state - hidden_ref)))

    print("KERNEL_OK")
</pallas_src>

<mosaic_0001>
module attributes {stable_mosaic.version = 11 : i64} {
  func.func @kernel(%arg0: memref<8x16xf32, #tpu.memory_space<vmem>>, %arg1: memref<16x64xf32, #tpu.memory_space<vmem>>, %arg2: memref<64x64xf32, #tpu.memory_space<vmem>>, %arg3: memref<9x64xf32, #tpu.memory_space<vmem>>, %arg4: memref<64x128xf32, #tpu.memory_space<vmem>>, %arg5: memref<1x128xf32, #tpu.memory_space<vmem>>, %arg6: memref<8x128xf32, #tpu.memory_space<vmem>>, %arg7: memref<2x32xf32, #tpu.memory_space<vmem>>, %arg8: memref<9x64xf32, #tpu.memory_space<vmem>>, %arg9: memref<8x64xf32, #tpu.memory_space<vmem>>) attributes {dimension_semantics = [], scalar_prefetch = 0 : i64, scratch_operands = 2 : i64, tpu.core_type = #tpu.core_type<tc>} {
    %c0 = arith.constant 0 : index
    %c0_0 = arith.constant 0 : index
    %0 = vector.load %arg0[%c0, %c0_0] : memref<8x16xf32, #tpu.memory_space<vmem>>, vector<8x16xf32>
    %c0_1 = arith.constant 0 : index
    %c0_2 = arith.constant 0 : index
    %1 = vector.load %arg1[%c0_1, %c0_2] : memref<16x64xf32, #tpu.memory_space<vmem>>, vector<16x64xf32>
    %cst = arith.constant dense<0.000000e+00> : vector<8x64xf32>
    %2 = tpu.matmul %0, %1, %cst {dimension_numbers = #tpu.dot_dimension_numbers<[1], [0], [0], [1], [0, 0, 1, 1], [], []>} : vector<8x16xf32>, vector<16x64xf32>, vector<8x64xf32> -> vector<8x64xf32>
    %c0_3 = arith.constant 0 : index
    %c0_4 = arith.constant 0 : index
    %3 = vector.load %arg3[%c0_3, %c0_4] : memref<9x64xf32, #tpu.memory_space<vmem>>, vector<8x64xf32>
    %4 = arith.addf %3, %2 : vector<8x64xf32>
    %c0_5 = arith.constant 0 : index
    %c0_6 = arith.constant 0 : index
    %5 = vector.load %arg8[%c0_5, %c0_6] : memref<9x64xf32, #tpu.memory_space<vmem>>, vector<8x64xf32>
    tpu.vector_store %arg8[%c0_5, %c0_6], %4 {strides = array<i32>} : memref<9x64xf32, #tpu.memory_space<vmem>>, vector<8x64xf32>,
    %c8 = arith.constant 8 : index
    %c0_7 = arith.constant 0 : index
    %6 = vector.load %arg3[%c8, %c0_7] : memref<9x64xf32, #tpu.memory_space<vmem>>, vector<1x64xf32>
    %c8_8 = arith.constant 8 : index
    %c0_9 = arith.constant 0 : index
    %7 = vector.load %arg8[%c8_8, %c0_9] : memref<9x64xf32, #tpu.memory_space<vmem>>, vector<1x64xf32>
    tpu.vector_store %arg8[%c8_8, %c0_9], %6 {strides = array<i32>} : memref<9x64xf32, #tpu.memory_space<vmem>>, vector<1x64xf32>,
    %c0_10 = arith.constant 0 : index
    %c0_11 = arith.constant 0 : index
    %8 = vector.load %arg8[%c0_10, %c0_11] : memref<9x64xf32, #tpu.memory_space<vmem>>, vector<1x64xf32>
    %c1 = arith.constant 1 : index
    %c0_12 = arith.constant 0 : index
    %9 = vector.load %arg8[%c1, %c0_12] : memref<9x64xf32, #tpu.memory_space<vmem>>, vector<1x64xf32>
    %c2 = arith.constant 2 : index
    %c0_13 = arith.constant 0 : index
    %10 = vector.load %arg8[%c2, %c0_13] : memref<9x64xf32, #tpu.memory_space<vmem>>, vector<1x64xf32>
    %c3 = arith.constant 3 : index
    %c0_14 = arith.constant 0 : index
    %11 = vector.load %arg8[%c3, %c0_14] : memref<9x64xf32, #tpu.memory_space<vmem>>, vector<1x64xf32>
    %c4 = arith.constant 4 : index
    %c0_15 = arith.constant 0 : index
    %12 = vector.load %arg8[%c4, %c0_15] : memref<9x64xf32, #tpu.memory_space<vmem>>, vector<1x64xf32>
    %c5 = arith.constant 5 : index
    %c0_16 = arith.constant 0 : index
    %13 = vector.load %arg8[%c5, %c0_16] : memref<9x64xf32, #tpu.memory_space<vmem>>, vector<1x64xf32>
    %c6 = arith.constant 6 : index
    %c0_17 = arith.constant 0 : index
    %14 = vector.load %arg8[%c6, %c0_17] : memref<9x64xf32, #tpu.memory_space<vmem>>, vector<1x64xf32>
    %c7 = arith.constant 7 : index
    %c0_18 = arith.constant 0 : index
    %15 = vector.load %arg8[%c7, %c0_18] : memref<9x64xf32, #tpu.memory_space<vmem>>, vector<1x64xf32>
    %c8_19 = arith.constant 8 : index
    %c0_20 = arith.constant 0 : index
    %16 = vector.load %arg8[%c8_19, %c0_20] : memref<9x64xf32, #tpu.memory_space<vmem>>, vector<1x64xf32>
    %c0_21 = arith.constant 0 : index
    %c0_22 = arith.constant 0 : index
    %17 = vector.load %arg2[%c0_21, %c0_22] : memref<64x64xf32, #tpu.memory_space<vmem>>, vector<64x64xf32>
    %cst_23 = arith.constant 0.000000e+00 : f32
    %18 = vector.broadcast %cst_23 : f32 to vector<1x64xf32>
    %cst_24 = arith.constant dense<0.000000e+00> : vector<1x64xf32>
    %19 = tpu.matmul %18, %17, %cst_24 {dimension_numbers = #tpu.dot_dimension_numbers<[1], [0], [0], [1], [0, 0, 1, 1], [], []>} : vector<1x64xf32>, vector<64x64xf32>, vector<1x64xf32> -> vector<1x64xf32>
    %20 = arith.addf %19, %8 : vector<1x64xf32>
    %21 = math.tanh %20 : vector<1x64xf32>
    %cst_25 = arith.constant dense<0.000000e+00> : vector<1x64xf32>
    %22 = tpu.matmul %21, %17, %cst_25 {dimension_numbers = #tpu.dot_dimension_numbers<[1], [0], [0], [1], [0, 0, 1, 1], [], []>} : vector<1x64xf32>, vector<64x64xf32>, vector<1x64xf32> -> vector<1x64xf32>
    %23 = arith.addf %22, %9 : vector<1x64xf32>
    %24 = math.tanh %23 : vector<1x64xf32>
    %c0_26 = arith.constant 0 : index
    %c0_27 = arith.constant 0 : index
    %25 = vector.load %arg9[%c0_26, %c0_27] : memref<8x64xf32, #tpu.memory_space<vmem>>, vector<1x64xf32>
    tpu.vector_store %arg9[%c0_26, %c0_27], %24 {strides = array<i32>} : memref<8x64xf32, #tpu.memory_space<vmem>>, vector<1x64xf32>,
    %cst_28 = arith.constant dense<0.000000e+00> : vector<1x64xf32>
    %26 = tpu.matmul %24, %17, %cst_28 {dimension_numbers = #tpu.dot_dimension_numbers<[1], [0], [0], [1], [0, 0, 1, 1], [], []>} : vector<1x64xf32>, vector<64x64xf32>, vector<1x64xf32> -> vector<1x64xf32>
    %27 = arith.addf %26, %10 : vector<1x64xf32>
    %28 = math.tanh %27 : vector<1x64xf32>
    %c1_29 = arith.constant 1 : index
    %c0_30 = arith.constant 0 : index
    %29 = vector.load %arg9[%c1_29, %c0_30] : memref<8x64xf32, #tpu.memory_space<vmem>>, vector<1x64xf32>
    tpu.vector_store %arg9[%c1_29, %c0_30], %28 {strides = array<i32>} : memref<8x64xf32, #tpu.memory_space<vmem>>, vector<1x64xf32>,
    %cst_31 = arith.constant dense<0.000000e+00> : vector<1x64xf32>
    %30 = tpu.matmul %28, %17, %cst_31 {dimension_numbers = #tpu.dot_dimension_numbers<[1], [0], [0], [1], [0, 0, 1, 1], [], []>} : vector<1x64xf32>, vector<64x64xf32>, vector<1x64xf32> -> vector<1x64xf32>
    %31 = arith.addf %30, %11 : vector<1x64xf32>
    %32 = math.tanh %31 : vector<1x64xf32>
    %c2_32 = arith.constant 2 : index
    %c0_33 = arith.constant 0 : index
    %33 = vector.load %arg9[%c2_32, %c0_33] : memref<8x64xf32, #tpu.memory_space<vmem>>, vector<1x64xf32>
    tpu.vector_store %arg9[%c2_32, %c0_33], %32 {strides = array<i32>} : memref<8x64xf32, #tpu.memory_space<vmem>>, vector<1x64xf32>,
    %cst_34 = arith.constant dense<0.000000e+00> : vector<1x64xf32>
    %34 = tpu.matmul %32, %17, %cst_34 {dimension_numbers = #tpu.dot_dimension_numbers<[1], [0], [0], [1], [0, 0, 1, 1], [], []>} : vector<1x64xf32>, vector<64x64xf32>, vector<1x64xf32> -> vector<1x64xf32>
    %35 = arith.addf %34, %12 : vector<1x64xf32>
    %36 = math.tanh %35 : vector<1x64xf32>
    %c3_35 = arith.constant 3 : index
    %c0_36 = arith.constant 0 : index
    %37 = vector.load %arg9[%c3_35, %c0_36] : memref<8x64xf32, #tpu.memory_space<vmem>>, vector<1x64xf32>
    tpu.vector_store %arg9[%c3_35, %c0_36], %36 {strides = array<i32>} : memref<8x64xf32, #tpu.memory_space<vmem>>, vector<1x64xf32>,
    %cst_37 = arith.constant dense<0.000000e+00> : vector<1x64xf32>
    %38 = tpu.matmul %36, %17, %cst_37 {dimension_numbers = #tpu.dot_dimension_numbers<[1], [0], [0], [1], [0, 0, 1, 1], [], []>} : vector<1x64xf32>, vector<64x64xf32>, vector<1x64xf32> -> vector<1x64xf32>
    %39 = arith.addf %38, %13 : vector<1x64xf32>
    %40 = math.tanh %39 : vector<1x64xf32>
    %c4_38 = arith.constant 4 : index
    %c0_39 = arith.constant 0 : index
    %41 = vector.load %arg9[%c4_38, %c0_39] : memref<8x64xf32, #tpu.memory_space<vmem>>, vector<1x64xf32>
    tpu.vector_store %arg9[%c4_38, %c0_39], %40 {strides = array<i32>} : memref<8x64xf32, #tpu.memory_space<vmem>>, vector<1x64xf32>,
    %cst_40 = arith.constant dense<0.000000e+00> : vector<1x64xf32>
    %42 = tpu.matmul %40, %17, %cst_40 {dimension_numbers = #tpu.dot_dimension_numbers<[1], [0], [0], [1], [0, 0, 1, 1], [], []>} : vector<1x64xf32>, vector<64x64xf32>, vector<1x64xf32> -> vector<1x64xf32>
    %43 = arith.addf %42, %14 : vector<1x64xf32>
    %44 = math.tanh %43 : vector<1x64xf32>
    %c5_41 = arith.constant 5 : index
    %c0_42 = arith.constant 0 : index
    %45 = vector.load %arg9[%c5_41, %c0_42] : memref<8x64xf32, #tpu.memory_space<vmem>>, vector<1x64xf32>
    tpu.vector_store %arg9[%c5_41, %c0_42], %44 {strides = array<i32>} : memref<8x64xf32, #tpu.memory_space<vmem>>, vector<1x64xf32>,
    %cst_43 = arith.constant dense<0.000000e+00> : vector<1x64xf32>
    %46 = tpu.matmul %44, %17, %cst_43 {dimension_numbers = #tpu.dot_dimension_numbers<[1], [0], [0], [1], [0, 0, 1, 1], [], []>} : vector<1x64xf32>, vector<64x64xf32>, vector<1x64xf32> -> vector<1x64xf32>
    %47 = arith.addf %46, %15 : vector<1x64xf32>
    %48 = math.tanh %47 : vector<1x64xf32>
    %c6_44 = arith.constant 6 : index
    %c0_45 = arith.constant 0 : index
    %49 = vector.load %arg9[%c6_44, %c0_45] : memref<8x64xf32, #tpu.memory_space<vmem>>, vector<1x64xf32>
    tpu.vector_store %arg9[%c6_44, %c0_45], %48 {strides = array<i32>} : memref<8x64xf32, #tpu.memory_space<vmem>>, vector<1x64xf32>,
    %cst_46 = arith.constant dense<0.000000e+00> : vector<1x64xf32>
    %50 = tpu.matmul %48, %17, %cst_46 {dimension_numbers = #tpu.dot_dimension_numbers<[1], [0], [0], [1], [0, 0, 1, 1], [], []>} : vector<1x64xf32>, vector<64x64xf32>, vector<1x64xf32> -> vector<1x64xf32>
    %51 = arith.addf %50, %16 : vector<1x64xf32>
    %52 = math.tanh %51 : vector<1x64xf32>
    %c7_47 = arith.constant 7 : index
    %c0_48 = arith.constant 0 : index
    %53 = vector.load %arg9[%c7_47, %c0_48] : memref<8x64xf32, #tpu.memory_space<vmem>>, vector<1x64xf32>
    tpu.vector_store %arg9[%c7_47, %c0_48], %52 {strides = array<i32>} : memref<8x64xf32, #tpu.memory_space<vmem>>, vector<1x64xf32>,
    %c0_49 = arith.constant 0 : index
    %c0_50 = arith.constant 0 : index
    %54 = vector.load %arg9[%c0_49, %c0_50] : memref<8x64xf32, #tpu.memory_space<vmem>>, vector<8x64xf32>
    %c0_51 = arith.constant 0 : index
    %c0_52 = arith.constant 0 : index
    %55 = vector.load %arg4[%c0_51, %c0_52] : memref<64x128xf32, #tpu.memory_space<vmem>>, vector<64x128xf32>
    %cst_53 = arith.constant dense<0.000000e+00> : vector<8x128xf32>
    %56 = tpu.matmul %54, %55, %cst_53 {dimension_numbers = #tpu.dot_dimension_numbers<[1], [0], [0], [1], [0, 0, 1, 1], [], []>} : vector<8x64xf32>, vector<64x128xf32>, vector<8x128xf32> -> vector<8x128xf32>
    %c0_54 = arith.constant 0 : index
    %c0_55 = arith.constant 0 : index
    %57 = vector.load %arg5[%c0_54, %c0_55] : memref<1x128xf32, #tpu.memory_space<vmem>>, vector<1x128xf32>
    %58 = vector.broadcast %57 : vector<1x128xf32> to vector<8x128xf32>
    %59 = arith.addf %56, %58 : vector<8x128xf32>
    %c0_56 = arith.constant 0 : index
    %c0_57 = arith.constant 0 : index
    %60 = vector.load %arg6[%c0_56, %c0_57] : memref<8x128xf32, #tpu.memory_space<vmem>>, vector<8x128xf32>
    tpu.vector_store %arg6[%c0_56, %c0_57], %59 {strides = array<i32>} : memref<8x128xf32, #tpu.memory_space<vmem>>, vector<8x128xf32>,
    %c6_58 = arith.constant 6 : index
    %c0_59 = arith.constant 0 : index
    %61 = vector.load %arg9[%c6_58, %c0_59] : memref<8x64xf32, #tpu.memory_space<vmem>>, vector<1x32xf32>
    %c7_60 = arith.constant 7 : index
    %c32 = arith.constant 32 : index
    %62 = vector.load %arg9[%c7_60, %c32] : memref<8x64xf32, #tpu.memory_space<vmem>>, vector<1x32xf32>
    %63 = tpu.concatenate %61, %62 in 0 : vector<1x32xf32>, vector<1x32xf32> -> vector<2x32xf32>
    %c0_61 = arith.constant 0 : index
    %c0_62 = arith.constant 0 : index
    %64 = vector.load %arg7[%c0_61, %c0_62] : memref<2x32xf32, #tpu.memory_space<vmem>>, vector<2x32xf32>
    tpu.vector_store %arg7[%c0_61, %c0_62], %63 {strides = array<i32>} : memref<2x32xf32, #tpu.memory_space<vmem>>, vector<2x32xf32>,
    return
  }
}

</mosaic_0001>

<bundles_post_ra>
// kernel: rnn_model_forward.1
= control target key start
LH: loop header
LB: loop body
LE: loop exit
PB: predicated region body
PF: predicated region fallthrough
CT: control target
= control target key end

     0   :  { %13 = vsyncpa [#allocation5], 0  ;;  %s1852_s0 = inlined_call_operand.hbm [shape: f32[8,16], index: 0, kind: input, shape index: {}]   ;;  %s1853_s1 = inlined_call_operand.vmem [shape: f32[16,64], index: 1, kind: input, shape index: {}]   ;;  %s1854_s2 = inlined_call_operand.hbm [shape: f32[64,64], index: 2, kind: input, shape index: {}]   ;;  %s1855_s3 = inlined_call_operand.hbm [shape: f32[9,64], index: 3, kind: input, shape index: {}]   ;;  %s1856_s4 = inlined_call_operand.hbm [shape: f32[64,128], index: 4, kind: input, shape index: {}]   ;;  %s1857_s5 = inlined_call_operand.vmem [shape: f32[1,128], index: 5, kind: input, shape index: {}]   ;;  %s1858_s6 = inlined_call_operand.hbm [shape: f32[8,128], index: 6, kind: output, shape index: {0}]   ;;  %s1859_s7 = inlined_call_operand.hbm [shape: f32[2,32], index: 7, kind: output, shape index: {1}]  }
   0x1   :  { %14 = vsyncpa [#allocation8], 0 }
   0x2   :  { %15 = vsyncpa [#allocation11], 0 }
   0x3   :  { %16 = vsyncpa [#allocation6], 0 }
   0x4   :  { %17 = vsyncpa [#allocation14], 0  ;;  %s1583_s24 = smov [#allocation7]   ;;  %s1441_s28 = scalar_lea.hbm %s1854_s2, 1024 }
   0x5   :  { %s35_s25 = sshll.u32 %s1583_s24, 4  ;;  %p1442_p0 = scmp.ne.s32.totalorder %s1854_s2, %s1441_s28  ;;  %s36_s25 = int_to_ptr.vmem [resolvable:$true] %s35_s25 }
   0x6   :  { %p1445_p1 = scmp.lt.u32.totalorder %s1441_s28, %s1854_s2 }
   0x8   :  { %p1447_p2 = pnand %p1445_p1, %p1442_p0 }
   0xa   :  { %1450 = shalt.err (!%p1447_p2)
}
   0xb   :  { %s1451_s10 = scalar_lea.vmem %s36_s25, 1024  ;;  %p1456_p4 = scmp.lt.s32.totalorder %s36_s25, %s36_s25 }
   0xc   :  { %p1452_p3 = scmp.ne.s32.totalorder %s36_s25, %s1451_s10  ;;  %p1457_p5 = scmp.lt.s32.totalorder %s1451_s10, %s1451_s10 }
   0xe   :  { %p1458_p6 = por %p1457_p5, %p1456_p4 }
  0x10   :  { %p1459_p7 = pnand %p1458_p6, %p1452_p3 }
  0x12   :  { %1462 = shalt.err (!%p1459_p7)
}
  0x13   :  { %s1584_s11 = smov 128   ;;  %s1585_s12 = smov 8  }
  0x14   :  { %41 = dma.hbm_to_vmem [thread:$0]  %s1854_s2, 1024, %s36_s25, [#allocation8], %s1584_s11, %s1584_s11, %s1585_s12  }
  0x15   :  { %s1586_s15 = smov [#allocation4]   ;;  %s1587_s17 = smov [#allocation9]  }
  0x16   :  { %s24_s16 = sshll.u32 %s1586_s15, 4  ;;  %s47_s18 = sshll.u32 %s1587_s17, 4  ;;  %s25_s16 = int_to_ptr.vmem [resolvable:$true] %s24_s16  ;;  %s48_s18 = int_to_ptr.vmem [resolvable:$true] %s47_s18 }
  0x17   :  { %s1463_s21 = scalar_lea.hbm %s1852_s0, 128 }
  0x18   :  { %p1464_p8 = scmp.ne.s32.totalorder %s1852_s0, %s1463_s21  ;;  %p1467_p9 = scmp.lt.u32.totalorder %s1463_s21, %s1852_s0 }
  0x1a   :  { %p1469_p10 = pnand %p1467_p9, %p1464_p8 }
  0x1c   :  { %1472 = shalt.err (!%p1469_p10)
}
  0x1d   :  { %s1473_s2 = scalar_lea.vmem %s25_s16, 128  ;;  %p1478_p12 = scmp.lt.s32.totalorder %s25_s16, %s25_s16 }
  0x1e   :  { %p1474_p11 = scmp.ne.s32.totalorder %s25_s16, %s1473_s2  ;;  %p1479_p13 = scmp.lt.s32.totalorder %s1473_s2, %s1473_s2 }
  0x20   :  { %p1480_p0 = por %p1479_p13, %p1478_p12 }
  0x22   :  { %p1481_p1 = pnand %p1480_p0, %p1474_p11 }
  0x24   :  { %1484 = shalt.err (!%p1481_p1)
}
  0x25   :  { %27 = dma.hbm_to_vmem [thread:$0]  %s1852_s0, 128, %s25_s16, [#allocation5]  }
  0x26   :  { %s1485_s30 = scalar_lea.hbm %s1855_s3, 256 }
  0x27   :  { %p1486_p2 = scmp.ne.s32.totalorder %s1855_s3, %s1485_s30  ;;  %p1489_p3 = scmp.lt.u32.totalorder %s1485_s30, %s1855_s3 }
  0x29   :  { %p1491_p4 = pnand %p1489_p3, %p1486_p2 }
  0x2b   :  { %1494 = shalt.err (!%p1491_p4)
}
  0x2c   :  { %s1495_s14 = scalar_lea.vmem %s48_s18, 256  ;;  %p1500_p6 = scmp.lt.s32.totalorder %s48_s18, %s48_s18 }
  0x2d   :  { %p1496_p5 = scmp.ne.s32.totalorder %s48_s18, %s1495_s14  ;;  %p1501_p7 = scmp.lt.s32.totalorder %s1495_s14, %s1495_s14 }
  0x2f   :  { %p1502_p8 = por %p1501_p7, %p1500_p6 }
  0x31   :  { %p1503_p9 = pnand %p1502_p8, %p1496_p5 }
  0x33   :  { %1506 = shalt.err (!%p1503_p9)
}
  0x34   :  { %53 = dma.hbm_to_vmem [thread:$0]  %s1855_s3, 256, %s48_s18, [#allocation8], %s1584_s11, %s1584_s11, %s1585_s12  }
  0x35   :  { %s1588_s16 = smov [#allocation10]   ;;  %s1507_s21 = scalar_lea.hbm %s1856_s4, 1024 }
  0x36   :  { %s59_s17 = sshll.u32 %s1588_s16, 4  ;;  %p1508_p10 = scmp.ne.s32.totalorder %s1856_s4, %s1507_s21  ;;  %s60_s17 = int_to_ptr.vmem [resolvable:$true] %s59_s17 }
  0x37   :  { %p1511_p11 = scmp.lt.u32.totalorder %s1507_s21, %s1856_s4 }
  0x39   :  { %p1513_p12 = pnand %p1511_p11, %p1508_p10 }
  0x3b   :  { %1516 = shalt.err (!%p1513_p12)
}
  0x3c   :  { %s1517_s2 = scalar_lea.vmem %s60_s17, 1024  ;;  %p1522_p0 = scmp.lt.s32.totalorder %s60_s17, %s60_s17 }
  0x3d   :  { %p1518_p13 = scmp.ne.s32.totalorder %s60_s17, %s1517_s2  ;;  %p1523_p1 = scmp.lt.s32.totalorder %s1517_s2, %s1517_s2 }
  0x3f   :  { %p1524_p2 = por %p1523_p1, %p1522_p0 }
  0x41   :  { %p1525_p3 = pnand %p1524_p2, %p1518_p13 }
  0x43   :  { %1528 = shalt.err (!%p1525_p3)
}
  0x44   :  { %65 = dma.hbm_to_vmem [thread:$0]  %s1856_s4, 1024, %s60_s17, [#allocation11], %s1584_s11, %s1584_s11, %s1585_s12  }
  0x45   :  { %1573 = dma.done.wait [#allocation5], 128  }
  0x46   :  { %1574 = vsyncadd [#allocation5], 4294967168 }
  0x47   :  { %1575 = dma.done.wait [#allocation8], 1280  }
  0x48   :  { %1576 = vsyncadd [#allocation8], 4294966016 }
  0x49   :  { %1577 = dma.done.wait [#allocation11], 1024  }
  0x4a   :  { %1578 = vsyncadd [#allocation11], 4294966272  ;;  %v1589_v0 = vmov 0.0|0.0   ;;  %vm1590_vm0 = vmmov 0   ;;  %v1591_v1 = vmov 0.0   ;;  %v173_v2 = vld [vmem:[#allocation7] sm:$0xff] }
  0x4b   :  { %1291 = vmatprep.subr.bf16.mxu1 %v1589_v0  ;;  %1288 = vmatprep.subr.bf16.mxu0 %v1589_v0  ;;  %v174_v3 = vld [vmem:[#allocation7 + $0x8] sm:$0xff]  ;;  %v81_v4 = vld [vmem:[%s1853_s1] sm:$0xff]  ;;  %v175_v7 = vld [vmem:[#allocation7 + $0x10] sm:$0xff]  ;;  %vm83_vm1 = vcmask 130048   ;;  %vm159_vm2 = vcmask 523264   ;;  %vm162_vm3 = vcmask 516096  }
  0x4c   :  { %1095 = vmatprep.mubr.msk.f32.mxu0 %vm1590_vm0, %v1591_v1  ;;  %1114 = vmatprep.mubr.msk.f32.mxu1 %vm1590_vm0, %v1591_v1  ;;  %v1701_v5 = vpack.c.bf16 %v174_v3, %v173_v2  ;;  %v82_v6 = vld [vmem:[%s1853_s1 + $0x8] sm:$0xff]  ;;  %v176_v9 = vld [vmem:[#allocation7 + $0x18] sm:$0xff]  ;;  %v177_v12 = vld [vmem:[#allocation7 + $0x20] sm:$0xff]  ;;  %s1592_s1 = smov 96   ;;  %s1593_s27 = smov [#allocation13]   ;;  %vm952_vm4 = vcmask 1040384  }
  0x4d   :  { %v1289_v8 = vpack.c.bf16 %v82_v6, %v81_v4  ;;  %v1707_v10 = vpack.c.bf16 %v176_v9, %v175_v7  ;;  %v80_v11 = vld [vmem:[#allocation4] sm:$0xff]  ;;  %v178_v13 = vld [vmem:[#allocation7 + $0x28] sm:$0xff]  ;;  %v179_v15 = vld [vmem:[#allocation7 + $0x30] sm:$0xff]  ;;  %s972_s28 = sshll.u32 %s1593_s27, 4  ;;  %vm954_vm5 = vcmask 254976   ;;  %s973_s28 = int_to_ptr.vmem [resolvable:$true] %s972_s28 }
  0x4e   :  { %1293 = vmatpush3.bf16.msra.mxu1 %v1701_v5  ;;  %v1712_v14 = vpack.c.bf16 %v178_v13, %v177_v12  ;;  %v180_v16 = vld [vmem:[#allocation7 + $0x38] sm:$0xff]  ;;  %v157_v18 = vld [vmem:[#allocation9] sm:$0xff]  ;;  %v161_v57 = vld [vmem:[#allocation9 + $0x8] sm:$0x1]  ;;  %s1529_s29 = scalar_lea.vmem %s973_s28, 32  ;;  %p1534_p5 = scmp.lt.s32.totalorder %s973_s28, %s973_s28 }
  0x4f   :  { %1290 = vmatpush3.bf16.msra.mxu0 %v1289_v8  ;;  %1294 = vmatprep.subr.bf16.mxu1 %v1589_v0  ;;  %v1720_v17 = vpack.c.bf16 %v180_v16, %v179_v15  ;;  %163 = vst.msk [vmem:[#allocation2 + $0x8] sm:$0x1] %vm162_vm3, %v161_v57  ;;  %v856_v63 = vld [vmem:[#allocation10] sm:$0xff]  ;;  %v857_v2 = vld [vmem:[#allocation10 + $0x8] sm:$0xff]  ;;  %v859_v4 = vld [vmem:[#allocation10 + $0x18] sm:$0xff]  ;;  %p1530_p4 = scmp.ne.s32.totalorder %s973_s28, %s1529_s29  ;;  %p1535_p6 = scmp.lt.s32.totalorder %s1529_s29, %s1529_s29 }
  0x50   :  { %1303 = vmatprep.subr.bf16.mxu0 %v1589_v0  ;;  %v1400_v3 = vpack.c.bf16 %v857_v2, %v856_v63  ;;  %v860_v6 = vld [vmem:[#allocation10 + $0x20] sm:$0xff]  ;;  %v861_v7 = vld [vmem:[#allocation10 + $0x28] sm:$0xff]  ;;  %v862_v8 = vld [vmem:[#allocation10 + $0x30] sm:$0xff] }
  0x51   :  { %v1406_v9 = vpack.c.bf16 %v861_v7, %v860_v6  ;;  %p1536_p7 = por %p1535_p6, %p1534_p5 }
  0x52   :  { %1096 = vmatmul.mubr.msk.f32.vlgmr.msra.gmra.mrb[0].mxu0 %vm83_vm1, %v80_v11  ;;  %1296 = vmatpush3.bf16.msra.mxu1 %v1707_v10 }
  0x53   :  { %1297 = vmatprep.subr.bf16.mxu1 %v1589_v0  ;;  %1305 = vmatpush3.bf16.msra.mxu0 %v1701_v5  ;;  %p1537_p8 = pnand %p1536_p7, %p1530_p4 }
  0x54   :  { %1306 = vmatprep.subr.bf16.mxu0 %v1589_v0  ;;  %1133 = vmatprep.mubr.msk.f32.mxu0 %vm1590_vm0, %v1591_v1 }
  0x56   :  { %1299 = vmatpush3.bf16.msra.mxu1 %v1712_v14  ;;  %v172_v12 = vld [vmem:[#allocation2 + $0x8] sm:$0x1] }
  0x57   :  { %1300 = vmatprep.subr.bf16.mxu1 %v1589_v0  ;;  %1308 = vmatpush3.bf16.msra.mxu0 %v1707_v10 }
  0x58   :  { %1309 = vmatprep.subr.bf16.mxu0 %v1589_v0 }
  0x5a   :  { %1302 = vmatpush3.bf16.msra.mxu1 %v1720_v17 }
  0x5b   :  { %1311 = vmatpush3.bf16.msra.mxu0 %v1712_v14  ;;  %1315 = vmatprep.subr.bf16.mxu1 %v1589_v0 }
  0x5c   :  { %1312 = vmatprep.subr.bf16.mxu0 %v1589_v0 }
  0x5d   :  { %1115 = vmatmul.mubr.f32.vlgmr.msra.gmra.mrb[0].mxu1 %v1591_v1 }
  0x5e   :  { %1317 = vmatpush3.bf16.msra.mxu1 %v1701_v5  ;;  %1152 = vmatprep.mubr.msk.f32.mxu1 %vm1590_vm0, %v1591_v1 }
  0x5f   :  { %1314 = vmatpush3.bf16.msra.mxu0 %v1720_v17  ;;  %1318 = vmatprep.subr.bf16.mxu1 %v1589_v0 }
  0x60   :  { %1327 = vmatprep.subr.bf16.mxu0 %v1589_v0 }
  0x62   :  { %1320 = vmatpush3.bf16.msra.mxu1 %v1707_v10 }
  0x63   :  { %1321 = vmatprep.subr.bf16.mxu1 %v1589_v0 }
  0x66   :  { %1323 = vmatpush3.bf16.msra.mxu1 %v1712_v14 }
  0x67   :  { %1324 = vmatprep.subr.bf16.mxu1 %v1589_v0 }
  0x6a   :  { %1326 = vmatpush3.bf16.msra.mxu1 %v1720_v17 }
  0x6b   :  { %1339 = vmatprep.subr.bf16.mxu1 %v1589_v0 }
 0x125   :  { %v153_v19 = vpop.f32.mrb[0].mxu0 }
 0x126   :  { %v158_v20 = vadd.f32 %v157_v18, %v153_v19  ;;  %v1097_v21 = vpop.f32.mrb[1].mxu0 }
 0x128   :  { %160 = vst.msk [vmem:[#allocation2] sm:$0xff] %vm159_vm2, %v158_v20 }
 0x12f   :  { %v164_v22 = vld [vmem:[#allocation2] sm:$0x1]  ;;  %v165_v27 = vld [vmem:[#allocation2 + $0x1] sm:$0x1]  ;;  %v166_v32 = vld [vmem:[#allocation2 + $0x2] sm:$0x1] }
 0x130   :  { %v250_v23 = vpop.f32.mrb[0].mxu1  ;;  %v167_v37 = vld [vmem:[#allocation2 + $0x3] sm:$0x1]  ;;  %v168_v42 = vld [vmem:[#allocation2 + $0x4] sm:$0x1] }
 0x131   :  { %v251_v24 = vadd.f32 %v250_v23, %v164_v22  ;;  %v1116_v25 = vpop.f32.mrb[1].mxu1  ;;  %v169_v47 = vld [vmem:[#allocation2 + $0x5] sm:$0x1]  ;;  %v170_v52 = vld [vmem:[#allocation2 + $0x6] sm:$0x1] }
 0x132   :  { %v171_v58 = vld [vmem:[#allocation2 + $0x7] sm:$0x1] }
 0x133   :  { %1423 = vtanh.f32 %v251_v24 }
 0x13d   :  { %v1424_v26 = vpop.eup %1423 }
 0x13e   :  { %1134 = vmatmul.mubr.msk.f32.vlgmr.msra.gmra.mrb[2].mxu0 %vm159_vm2, %v1424_v26 }
 0x13f   :  { %1329 = vmatpush3.bf16.msra.mxu0 %v1701_v5  ;;  %1171 = vmatprep.mubr.msk.f32.mxu0 %vm1590_vm0, %v1591_v1 }
 0x140   :  { %1330 = vmatprep.subr.bf16.mxu0 %v1589_v0 }
 0x143   :  { %1332 = vmatpush3.bf16.msra.mxu0 %v1707_v10 }
 0x144   :  { %1333 = vmatprep.subr.bf16.mxu0 %v1589_v0 }
 0x147   :  { %1335 = vmatpush3.bf16.msra.mxu0 %v1712_v14 }
 0x148   :  { %1336 = vmatprep.subr.bf16.mxu0 %v1589_v0 }
 0x14b   :  { %1338 = vmatpush3.bf16.msra.mxu0 %v1720_v17 }
 0x14c   :  { %1351 = vmatprep.subr.bf16.mxu0 %v1589_v0 }
 0x211   :  { %v324_v28 = vpop.f32.mrb[2].mxu0 }
 0x212   :  { %v325_v29 = vadd.f32 %v324_v28, %v165_v27  ;;  %v1135_v30 = vpop.f32.mrb[3].mxu0 }
 0x214   :  { %1425 = vtanh.f32 %v325_v29 }
 0x21e   :  { %v1426_v31 = vpop.eup %1425 }
 0x21f   :  { %329 = vst.msk [vmem:[#allocation3] sm:$0x1] %vm162_vm3, %v1426_v31  ;;  %1153 = vmatmul.mubr.msk.f32.vlgmr.msra.gmra.mrb[2].mxu1 %vm159_vm2, %v1426_v31 }
 0x220   :  { %1341 = vmatpush3.bf16.msra.mxu1 %v1701_v5  ;;  %1190 = vmatprep.mubr.msk.f32.mxu1 %vm1590_vm0, %v1591_v1 }
 0x221   :  { %1342 = vmatprep.subr.bf16.mxu1 %v1589_v0 }
 0x224   :  { %1344 = vmatpush3.bf16.msra.mxu1 %v1707_v10 }
 0x225   :  { %1345 = vmatprep.subr.bf16.mxu1 %v1589_v0 }
 0x228   :  { %1347 = vmatpush3.bf16.msra.mxu1 %v1712_v14 }
 0x229   :  { %1348 = vmatprep.subr.bf16.mxu1 %v1589_v0 }
 0x22c   :  { %1350 = vmatpush3.bf16.msra.mxu1 %v1720_v17 }
 0x22d   :  { %1363 = vmatprep.subr.bf16.mxu1 %v1589_v0 }
 0x2f2   :  { %v399_v33 = vpop.f32.mrb[2].mxu1 }
 0x2f3   :  { %v400_v34 = vadd.f32 %v399_v33, %v166_v32  ;;  %v1154_v35 = vpop.f32.mrb[3].mxu1 }
 0x2f5   :  { %1427 = vtanh.f32 %v400_v34 }
 0x2ff   :  { %v1428_v36 = vpop.eup %1427 }
 0x300   :  { %404 = vst.msk [vmem:[#allocation3 + $0x1] sm:$0x1] %vm162_vm3, %v1428_v36  ;;  %1172 = vmatmul.mubr.msk.f32.vlgmr.msra.gmra.mrb[4].mxu0 %vm159_vm2, %v1428_v36 }
 0x301   :  { %1353 = vmatpush3.bf16.msra.mxu0 %v1701_v5  ;;  %1209 = vmatprep.mubr.msk.f32.mxu0 %vm1590_vm0, %v1591_v1 }
 0x302   :  { %1354 = vmatprep.subr.bf16.mxu0 %v1589_v0 }
 0x305   :  { %1356 = vmatpush3.bf16.msra.mxu0 %v1707_v10 }
 0x306   :  { %1357 = vmatprep.subr.bf16.mxu0 %v1589_v0 }
 0x309   :  { %1359 = vmatpush3.bf16.msra.mxu0 %v1712_v14 }
 0x30a   :  { %1360 = vmatprep.subr.bf16.mxu0 %v1589_v0 }
 0x30d   :  { %1362 = vmatpush3.bf16.msra.mxu0 %v1720_v17 }
 0x30e   :  { %1375 = vmatprep.subr.bf16.mxu0 %v1589_v0 }
 0x3d3   :  { %v474_v38 = vpop.f32.mrb[4].mxu0 }
 0x3d4   :  { %v475_v39 = vadd.f32 %v474_v38, %v167_v37  ;;  %v1173_v40 = vpop.f32.mrb[5].mxu0 }
 0x3d6   :  { %1429 = vtanh.f32 %v475_v39 }
 0x3e0   :  { %v1430_v41 = vpop.eup %1429 }
 0x3e1   :  { %479 = vst.msk [vmem:[#allocation3 + $0x2] sm:$0x1] %vm162_vm3, %v1430_v41  ;;  %1191 = vmatmul.mubr.msk.f32.vlgmr.msra.gmra.mrb[4].mxu1 %vm159_vm2, %v1430_v41 }
 0x3e2   :  { %1365 = vmatpush3.bf16.msra.mxu1 %v1701_v5  ;;  %1228 = vmatprep.mubr.msk.f32.mxu1 %vm1590_vm0, %v1591_v1 }
 0x3e3   :  { %1366 = vmatprep.subr.bf16.mxu1 %v1589_v0 }
 0x3e6   :  { %1368 = vmatpush3.bf16.msra.mxu1 %v1707_v10 }
 0x3e7   :  { %1369 = vmatprep.subr.bf16.mxu1 %v1589_v0 }
 0x3ea   :  { %1371 = vmatpush3.bf16.msra.mxu1 %v1712_v14 }
 0x3eb   :  { %1372 = vmatprep.subr.bf16.mxu1 %v1589_v0 }
 0x3ee   :  { %1374 = vmatpush3.bf16.msra.mxu1 %v1720_v17 }
 0x3ef   :  { %1387 = vmatprep.subr.bf16.mxu1 %v1589_v0 }
 0x4b4   :  { %v549_v43 = vpop.f32.mrb[4].mxu1 }
 0x4b5   :  { %v550_v44 = vadd.f32 %v549_v43, %v168_v42  ;;  %v1192_v45 = vpop.f32.mrb[5].mxu1 }
 0x4b7   :  { %1431 = vtanh.f32 %v550_v44 }
 0x4c1   :  { %v1432_v46 = vpop.eup %1431 }
 0x4c2   :  { %554 = vst.msk [vmem:[#allocation3 + $0x3] sm:$0x1] %vm162_vm3, %v1432_v46  ;;  %1210 = vmatmul.mubr.msk.f32.vlgmr.msra.gmra.mrb[6].mxu0 %vm159_vm2, %v1432_v46 }
 0x4c3   :  { %1377 = vmatpush3.bf16.msra.mxu0 %v1701_v5  ;;  %1247 = vmatprep.mubr.msk.f32.mxu0 %vm1590_vm0, %v1591_v1 }
 0x4c4   :  { %1378 = vmatprep.subr.bf16.mxu0 %v1589_v0 }
 0x4c7   :  { %1380 = vmatpush3.bf16.msra.mxu0 %v1707_v10 }
 0x4c8   :  { %1381 = vmatprep.subr.bf16.mxu0 %v1589_v0 }
 0x4cb   :  { %1383 = vmatpush3.bf16.msra.mxu0 %v1712_v14 }
 0x4cc   :  { %1384 = vmatprep.subr.bf16.mxu0 %v1589_v0 }
 0x4cf   :  { %1386 = vmatpush3.bf16.msra.mxu0 %v1720_v17 }
 0x4d0   :  { %1399 = vmatprep.subr.bf16.mxu0 %v1589_v0 }
 0x595   :  { %v624_v48 = vpop.f32.mrb[6].mxu0 }
 0x596   :  { %v625_v49 = vadd.f32 %v624_v48, %v169_v47  ;;  %v1211_v50 = vpop.f32.mrb[7].mxu0 }
 0x598   :  { %1433 = vtanh.f32 %v625_v49 }
 0x5a2   :  { %v1434_v51 = vpop.eup %1433 }
 0x5a3   :  { %629 = vst.msk [vmem:[#allocation3 + $0x4] sm:$0x1] %vm162_vm3, %v1434_v51  ;;  %1229 = vmatmul.mubr.msk.f32.vlgmr.msra.gmra.mrb[6].mxu1 %vm159_vm2, %v1434_v51 }
 0x5a4   :  { %1389 = vmatpush3.bf16.msra.mxu1 %v1701_v5  ;;  %1266 = vmatprep.mubr.msk.f32.mxu1 %vm1590_vm0, %v1591_v1 }
 0x5a5   :  { %1390 = vmatprep.subr.bf16.mxu1 %v1589_v0 }
 0x5a8   :  { %1392 = vmatpush3.bf16.msra.mxu1 %v1707_v10  ;;  %v863_v10 = vld [vmem:[#allocation10 + $0x38] sm:$0xff] }
 0x5a9   :  { %1393 = vmatprep.subr.bf16.mxu1 %v1589_v0  ;;  %v1409_v11 = vpack.c.bf16 %v863_v10, %v862_v8 }
 0x5ac   :  { %1395 = vmatpush3.bf16.msra.mxu1 %v1712_v14 }
 0x5ad   :  { %1396 = vmatprep.subr.bf16.mxu1 %v1589_v0 }
 0x5b0   :  { %1398 = vmatpush3.bf16.msra.mxu1 %v1720_v17 }
 0x676   :  { %v699_v53 = vpop.f32.mrb[6].mxu1 }
 0x677   :  { %v700_v54 = vadd.f32 %v699_v53, %v170_v52  ;;  %v1230_v55 = vpop.f32.mrb[7].mxu1 }
 0x679   :  { %1435 = vtanh.f32 %v700_v54 }
 0x683   :  { %v1436_v56 = vpop.eup %1435 }
 0x684   :  { %704 = vst.msk [vmem:[#allocation3 + $0x5] sm:$0x1] %vm162_vm3, %v1436_v56  ;;  %1248 = vmatmul.mubr.msk.f32.vlgmr.msra.gmra.mrb[8].mxu0 %vm159_vm2, %v1436_v56 }
 0x685   :  { %1285 = vmatprep.mubr.msk.f32.mxu0 %vm1590_vm0, %v1591_v1  ;;  %1401 = vmatpush3.bf16.msra.mxu0 %v1400_v3  ;;  %v858_v1 = vld [vmem:[#allocation10 + $0x10] sm:$0xff] }
 0x686   :  { %1402 = vmatprep.subr.bf16.mxu0 %v1589_v0  ;;  %v1403_v5 = vpack.c.bf16 %v859_v4, %v858_v1 }
 0x689   :  { %1404 = vmatpush3.bf16.msra.mxu0 %v1403_v5 }
 0x68a   :  { %1405 = vmatprep.subr.bf16.mxu0 %v1589_v0 }
 0x68d   :  { %1407 = vmatpush3.bf16.msra.mxu0 %v1406_v9 }
 0x68e   :  { %1408 = vmatprep.subr.bf16.mxu0 %v1589_v0 }
 0x691   :  { %1410 = vmatpush3.bf16.msra.mxu0 %v1409_v11 }
 0x757   :  { %v774_v59 = vpop.f32.mrb[8].mxu0 }
 0x758   :  { %v775_v60 = vadd.f32 %v774_v59, %v171_v58  ;;  %v1249_v61 = vpop.f32.mrb[9].mxu0 }
 0x75a   :  { %1437 = vtanh.f32 %v775_v60 }
 0x764   :  { %v1438_v62 = vpop.eup %1437 }
 0x765   :  { %779 = vst.msk [vmem:[#allocation3 + $0x6] sm:$0x1] %vm162_vm3, %v1438_v62  ;;  %1267 = vmatmul.mubr.msk.f32.vlgmr.msra.gmra.mrb[8].mxu1 %vm159_vm2, %v1438_v62 }
 0x76c   :  { %v945_v0 = vld [vmem:[#allocation3 + $0x6] sm:$0x1] }
 0x838   :  { %v849_v13 = vpop.f32.mrb[8].mxu1 }
 0x839   :  { %v850_v14 = vadd.f32 %v849_v13, %v172_v12  ;;  %v1268_v15 = vpop.f32.mrb[9].mxu1 }
 0x83b   :  { %1439 = vtanh.f32 %v850_v14 }
 0x845   :  { %v1440_v16 = vpop.eup %1439 }
 0x846   :  { %854 = vst.msk [vmem:[#allocation3 + $0x7] sm:$0x1] %vm162_vm3, %v1440_v16 }
 0x84d   :  { %v855_v17 = vld [vmem:[#allocation3] sm:$0xff] }
 0x84e   :  { %v946_v18 = vld [vmem:[#allocation3 + $0x7] sm:$0x1]  ;;  %1286 = vmatmul.mubr.msk.f32.vlgmr.msra.gmra.mrb[10].mxu0 %vm159_vm2, %v855_v17 }
 0x84f   :  { %v948_v19 = vrot.slane %v946_v18, 7 }
 0x851   :  { %949 = vrot.lane.b32.xlu0 %v948_v19, %s1592_s1 }
 0x8c3   :  { %v950_v20 = vpop.permute.xlu0 %949 }
 0x8c4   :  { %v953_v21 = vsel %vm952_vm4, %v945_v0, %v950_v20 }
 0x8c5   :  { %955 = vst.msk [vmem:[#allocation13] sm:$0x3] %vm954_vm5, %v953_v21 }
 0x8c6   :  { %1540 = shalt.err (!%p1537_p8)
}
 0x8c7   :  { %s1541_s9 = scalar_lea.hbm %s1859_s7, 32 }
 0x8c8   :  { %p1542_p9 = scmp.ne.s32.totalorder %s1859_s7, %s1541_s9  ;;  %p1545_p10 = scmp.lt.u32.totalorder %s1541_s9, %s1859_s7 }
 0x8ca   :  { %p1547_p11 = pnand %p1545_p10, %p1542_p9 }
 0x8cc   :  { %1550 = shalt.err (!%p1547_p11)
}
 0x8cd   :  { %975 = dma.vmem_to_hbm [thread:$0]  %s973_s28, 32, %s1859_s7, [#allocation14]   ;;  %v996_v22 = vld [vmem:[%s1857_s5] ss:$0 sm:$0xff] }
 0x8ce   :  { %s1594_s20 = smov [#allocation12]  }
 0x8cf   :  { %s962_s21 = sshll.u32 %s1594_s20, 4  ;;  %s963_s21 = int_to_ptr.vmem [resolvable:$true] %s962_s21 }
 0x8d0   :  { %s1551_s22 = scalar_lea.vmem %s963_s21, 128  ;;  %p1556_p13 = scmp.lt.s32.totalorder %s963_s21, %s963_s21 }
 0x8d1   :  { %p1552_p12 = scmp.ne.s32.totalorder %s963_s21, %s1551_s22  ;;  %p1557_p0 = scmp.lt.s32.totalorder %s1551_s22, %s1551_s22 }
 0x8d3   :  { %p1558_p1 = por %p1557_p0, %p1556_p13 }
 0x8d5   :  { %p1559_p2 = pnand %p1558_p1, %p1552_p12 }
 0x921   :  { %v940_v23 = vpop.f32.mrb[10].mxu0 }
 0x922   :  { %v941_v24 = vadd.f32 %v996_v22, %v940_v23  ;;  %v1287_v25 = vpop.f32.mrb[11].mxu0 }
 0x924   :  { %944 = vst [vmem:[#allocation12] sm:$0xff] %v941_v24 }
 0x925   :  { %1562 = shalt.err (!%p1559_p2)
}
 0x926   :  { %s1563_s24 = scalar_lea.hbm %s1858_s6, 128 }
 0x927   :  { %p1564_p3 = scmp.ne.s32.totalorder %s1858_s6, %s1563_s24  ;;  %p1567_p4 = scmp.lt.u32.totalorder %s1563_s24, %s1858_s6 }
 0x929   :  { %p1569_p5 = pnand %p1567_p4, %p1564_p3 }
 0x92b   :  { %1572 = shalt.err (!%p1569_p5)
}
 0x92c   :  { %965 = dma.vmem_to_hbm [thread:$0]  %s963_s21, 128, %s1858_s6, [#allocation6]  }
 0x92d   :  { %1579 = dma.done.wait [#allocation6], 128  }
 0x92e   :  { %1580 = vsyncadd [#allocation6], 4294967168 }
 0x92f   :  { %1581 = dma.done.wait [#allocation14], 32  }
 0x930   :  { %1582 = vsyncadd [#allocation14], 4294967264 }
 0x931   :  { %982 = vsyncpa [#allocation5], 1 }
 0x932   :  { %983 = vsyncpa [#allocation8], 1 }
 0x933   :  { %984 = vsyncpa [#allocation11], 1 }
 0x934   :  { %985 = vsyncpa [#allocation6], 1 }
 0x935   :  { %986 = vsyncpa [#allocation14], 1 }

</bundles_post_ra>
